<compile_context>
chip_gen: v7x
topology: tpu7x:2x2x1
jax: 0.10.0
libtpu: 0.0.40
codegen_flags: <defaults>
</compile_context>

<pallas_src>
import functools

import jax
import jax.numpy as jnp
from jax.experimental import pallas as pl
from jax.experimental.pallas import tpu as pltpu


LANE = 128            # TPU lane width: weight class-axis padded to this for the MXU
SUBLANE = 8           # f32 sublane granularity for batch-tile alignment
DEFAULT_TILE_M = 1024
PALLAS_MIN_BATCH = 2048  # below this, plain XLA is at least as fast


def _round_up(n, m):
    return ((n + m - 1) // m) * m


def prepare_params(weight, bias, dtype=jnp.float32):
    """One-time parameter preprocessing (hoisted out of the hot path).

    weight: (C, F) PyTorch nn.Linear layout
    bias:   (C,)
    Returns (w_t_padded (F, C_pad=128-rounded), bias_2d (1, C)).
    Padded weight columns are zero, so the in-kernel lane slice is exact.
    """
    C, F = weight.shape
    C_pad = _round_up(C, LANE)
    w_t = jnp.zeros((F, C_pad), dtype=dtype).at[:, :C].set(weight.T.astype(dtype))
    b2d = bias.astype(dtype).reshape(1, C)
    return w_t, b2d


def _linear_kernel(x_ref, w_ref, b_ref, o_ref, *, num_classes):
    # Lane-aligned MXU matmul (N = 128), then keep only the real class lanes
    # before the store so the HBM writeback carries num_classes columns only.
    acc = jnp.dot(x_ref[...], w_ref[...], preferred_element_type=jnp.float32)
    o_ref[...] = (acc[:, :num_classes] + b_ref[...]).astype(o_ref.dtype)


@functools.partial(jax.jit, static_argnums=(3,))
def slide_classifier_forward_pallas(x, w_t_padded, bias_2d, tile_m=DEFAULT_TILE_M):
    """Pallas path of SlideClassifier.forward.

    x:           (B, F) float32
    w_t_padded:  (F, C_pad) pre-transposed, zero-padded weight (prepare_params)
    bias_2d:     (1, C) bias
    returns      (B, C)
    """
    B, F = x.shape
    Fp, C_pad = w_t_padded.shape
    assert Fp == F
    C = bias_2d.shape[1]

    # Batch tile: multiple of the sublane, capped at tile_m.  The grid uses
    # cdiv, so no wrapper-side padding: Mosaic clips the ragged last tile
    # (OOB input rows only produce OOB output rows, whose stores are dropped).
    TM = _round_up(min(tile_m, _round_up(B, SUBLANE)), SUBLANE)
    grid = (pl.cdiv(B, TM),)

    kernel = functools.partial(_linear_kernel, num_classes=C)

    return pl.pallas_call(
        kernel,
        out_shape=jax.ShapeDtypeStruct((B, C), x.dtype),
        grid_spec=pltpu.PrefetchScalarGridSpec(
            num_scalar_prefetch=0,
            grid=grid,
            in_specs=[
                pl.BlockSpec((TM, F), lambda i: (i, 0)),       # x: tiled over batch
                pl.BlockSpec((F, C_pad), lambda i: (0, 0)),    # W^T: replicated
                pl.BlockSpec((1, C), lambda i: (0, 0)),        # bias: replicated
            ],
            out_specs=pl.BlockSpec((TM, C), lambda i: (i, 0)),
        ),
        compiler_params=pltpu.CompilerParams(
            dimension_semantics=("parallel",),                 # shard batch tiles across TCs
        ),
        cost_estimate=pl.CostEstimate(
            flops=2 * B * F * C_pad,
            transcendentals=0,
            bytes_accessed=4 * (B * F + F * C_pad + C + B * C),
        ),
    )(x, w_t_padded, bias_2d)


def slide_classifier_forward(x, w_t_padded, bias_2d, tile_m=DEFAULT_TILE_M):
    """Dispatcher: plain XLA for tiny batches (launch-overhead bound),
    Pallas kernel for large batches."""
    B = x.shape[0]
    C = bias_2d.shape[1]
    if B < PALLAS_MIN_BATCH:
        return (x @ w_t_padded)[:, :C] + bias_2d
    return slide_classifier_forward_pallas(x, w_t_padded, bias_2d, tile_m)


if __name__ == "__main__":
    num_features = 32
    num_classes = 10
    batch = 8

    key = jax.random.PRNGKey(0)
    kx, kw, kb, kx2, kx3 = jax.random.split(key, 5)

    # Deterministic synthetic parameters (same shapes as nn.Linear(32, 10)).
    x = jax.random.normal(kx, (batch, num_features), dtype=jnp.float32)
    bound = 1.0 / (num_features ** 0.5)
    weight = jax.random.uniform(
        kw, (num_classes, num_features), minval=-bound, maxval=bound,
        dtype=jnp.float32)
    bias = jax.random.uniform(
        kb, (num_classes,), minval=-bound, maxval=bound, dtype=jnp.float32)

    # One-time parameter prep (transpose + lane padding hoisted out of forward).
    w_t_padded, bias_2d = prepare_params(weight, bias)

    # Exercise the Pallas path directly (the dispatcher would route batches
    # this small to plain XLA).
    out = slide_classifier_forward_pallas(x, w_t_padded, bias_2d)
    out = jax.block_until_ready(out)

    ref = x @ weight.T + bias
    assert out.shape == (batch, num_classes)
    assert jnp.allclose(out, ref, atol=1e-5, rtol=1e-5)

    # Batch that is not a multiple of the sublane (ragged single tile).
    x2 = jax.random.normal(kx2, (13, num_features), dtype=jnp.float32)
    out2 = jax.block_until_ready(
        slide_classifier_forward_pallas(x2, w_t_padded, bias_2d))
    ref2 = x2 @ weight.T + bias
    assert out2.shape == (13, num_classes)
    assert jnp.allclose(out2, ref2, atol=1e-5, rtol=1e-5)

    # Multi-tile batch with a ragged last tile (grid = 3 with TM = 1024).
    x3 = jax.random.normal(kx3, (2500, num_features), dtype=jnp.float32)
    out3 = jax.block_until_ready(
        slide_classifier_forward_pallas(x3, w_t_padded, bias_2d))
    ref3 = x3 @ weight.T + bias
    assert out3.shape == (2500, num_classes)
    assert jnp.allclose(out3, ref3, atol=1e-5, rtol=1e-5)

    print("KERNEL_OK")
</pallas_src>

<mosaic_0001>
module attributes {stable_mosaic.version = 11 : i64} {
  func.func @_linear_kernel(%arg0: i32, %arg1: memref<8x32xf32, #tpu.memory_space<vmem>>, %arg2: memref<32x128xf32, #tpu.memory_space<vmem>>, %arg3: memref<1x10xf32, #tpu.memory_space<vmem>>, %arg4: memref<8x10xf32, #tpu.memory_space<vmem>>) attributes {dimension_semantics = [#tpu.dimension_semantics<parallel>], iteration_bounds = array<i64: 1>, scalar_prefetch = 0 : i64, scratch_operands = 0 : i64, tpu.core_type = #tpu.core_type<tc>, window_params = [{transform_indices = @transform_0, window_bounds = array<i64: 8, 32>}, {pipeline_mode = #tpu.pipeline_mode<synchronous>, transform_indices = @transform_1, window_bounds = array<i64: 32, 128>}, {pipeline_mode = #tpu.pipeline_mode<synchronous>, transform_indices = @transform_2, window_bounds = array<i64: 1, 10>}, {transform_indices = @transform_3, window_bounds = array<i64: 8, 10>}]} {
    %c0 = arith.constant 0 : index
    %c0_0 = arith.constant 0 : index
    %0 = vector.load %arg1[%c0, %c0_0] : memref<8x32xf32, #tpu.memory_space<vmem>>, vector<8x32xf32>
    %c0_1 = arith.constant 0 : index
    %c0_2 = arith.constant 0 : index
    %1 = vector.load %arg2[%c0_1, %c0_2] : memref<32x128xf32, #tpu.memory_space<vmem>>, vector<32x128xf32>
    %cst = arith.constant dense<0.000000e+00> : vector<8x128xf32>
    %2 = tpu.matmul %0, %1, %cst {dimension_numbers = #tpu.dot_dimension_numbers<[1], [0], [0], [1], [0, 0, 1, 1], [], []>} : vector<8x32xf32>, vector<32x128xf32>, vector<8x128xf32> -> vector<8x128xf32>
    %3 = vector.extract_strided_slice %2 {offsets = [0, 0], sizes = [8, 10], strides = [1, 1]} : vector<8x128xf32> to vector<8x10xf32>
    %c0_3 = arith.constant 0 : index
    %c0_4 = arith.constant 0 : index
    %4 = vector.load %arg3[%c0_3, %c0_4] : memref<1x10xf32, #tpu.memory_space<vmem>>, vector<1x10xf32>
    %5 = vector.broadcast %4 : vector<1x10xf32> to vector<8x10xf32>
    %6 = arith.addf %3, %5 : vector<8x10xf32>
    %c0_5 = arith.constant 0 : index
    %c0_6 = arith.constant 0 : index
    %7 = vector.load %arg4[%c0_5, %c0_6] : memref<8x10xf32, #tpu.memory_space<vmem>>, vector<8x10xf32>
    tpu.vector_store %arg4[%c0_5, %c0_6], %6 {strides = array<i32>} : memref<8x10xf32, #tpu.memory_space<vmem>>, vector<8x10xf32>,
    return
  }
  func.func @transform_0(%arg0: i32) -> (i32, i32) {
    %c0_i32 = arith.constant 0 : i32
    %c0_i32_0 = arith.constant 0 : i32
    return %arg0, %c0_i32 : i32, i32
  }
  func.func @transform_1(%arg0: i32) -> (i32, i32) {
    %c0_i32 = arith.constant 0 : i32
    %c0_i32_0 = arith.constant 0 : i32
    %c0_i32_1 = arith.constant 0 : i32
    return %c0_i32, %c0_i32_0 : i32, i32
  }
  func.func @transform_2(%arg0: i32) -> (i32, i32) {
    %c0_i32 = arith.constant 0 : i32
    %c0_i32_0 = arith.constant 0 : i32
    %c0_i32_1 = arith.constant 0 : i32
    return %c0_i32, %c0_i32_0 : i32, i32
  }
  func.func @transform_3(%arg0: i32) -> (i32, i32) {
    %c0_i32 = arith.constant 0 : i32
    %c0_i32_0 = arith.constant 0 : i32
    return %arg0, %c0_i32 : i32, i32
  }
}

</mosaic_0001>

<bundles_post_ra>
// kernel: slide_classifier_forward_pallas.1
= control target key start
LH: loop header
LB: loop body
LE: loop exit
PB: predicated region body
PF: predicated region fallthrough
CT: control target
= control target key end

     0   :  { %8 = vsyncpa [#allocation3], 0  ;;  %s324_s0 = inlined_call_operand.hbm [shape: f32[8,32], index: 0, kind: input, shape index: {}]   ;;  %s325_s1 = inlined_call_operand.hbm [shape: f32[32,128], index: 1, kind: input, shape index: {}]   ;;  %s326_s2 = inlined_call_operand.vmem [shape: f32[1,10], index: 2, kind: input, shape index: {}]   ;;  %s327_s3 = inlined_call_operand.hbm [shape: f32[8,10], index: 3, kind: output, shape index: {}]  }
   0x1   :  { %9 = vsyncpa [#allocation6], 0 }
   0x2   :  { %10 = vsyncpa [#allocation4], 0  ;;  %s250_s12 = smov [#allocation2]   ;;  %s251_s14 = smov [#allocation5]  }
   0x3   :  { %s17_s13 = sshll.u32 %s250_s12, 4  ;;  %s26_s15 = sshll.u32 %s251_s14, 4  ;;  %s18_s13 = int_to_ptr.vmem [resolvable:$true] %s17_s13  ;;  %s278_s15 = int_to_ptr.vmem [resolvable:$true] %s26_s15 }
   0x4   :  { %s178_s18 = scalar_lea.hbm %s324_s0, 128 }
   0x5   :  { %p179_p0 = scmp.ne.s32.totalorder %s324_s0, %s178_s18  ;;  %p182_p1 = scmp.lt.u32.totalorder %s178_s18, %s324_s0 }
   0x7   :  { %p184_p2 = pnand %p182_p1, %p179_p0 }
   0x9   :  { %187 = shalt.err (!%p184_p2)
}
   0xa   :  { %s188_s23 = scalar_lea.vmem %s18_s13, 128  ;;  %p193_p4 = scmp.lt.s32.totalorder %s18_s13, %s18_s13 }
   0xb   :  { %p189_p3 = scmp.ne.s32.totalorder %s18_s13, %s188_s23  ;;  %p194_p5 = scmp.lt.s32.totalorder %s188_s23, %s188_s23 }
   0xd   :  { %p195_p6 = por %p194_p5, %p193_p4 }
   0xf   :  { %p196_p7 = pnand %p195_p6, %p189_p3 }
  0x11   :  { %199 = shalt.err (!%p196_p7)
}
  0x12   :  { %20 = dma.hbm_to_vmem [thread:$0]  %s324_s0, 128, %s18_s13, [#allocation3]  }
  0x13   :  { %s200_s28 = scalar_lea.hbm %s325_s1, 512 }
  0x14   :  { %p201_p8 = scmp.ne.s32.totalorder %s325_s1, %s200_s28  ;;  %p204_p9 = scmp.lt.u32.totalorder %s200_s28, %s325_s1 }
  0x16   :  { %p206_p10 = pnand %p204_p9, %p201_p8 }
  0x18   :  { %209 = shalt.err (!%p206_p10)
}
  0x19   :  { %s210_s6 = scalar_lea.vmem %s278_s15, 512  ;;  %p215_p12 = scmp.lt.s32.totalorder %s278_s15, %s278_s15 }
  0x1a   :  { %p211_p11 = scmp.ne.s32.totalorder %s278_s15, %s210_s6  ;;  %p216_p13 = scmp.lt.s32.totalorder %s210_s6, %s210_s6 }
  0x1c   :  { %p217_p0 = por %p216_p13, %p215_p12 }
  0x1e   :  { %p218_p1 = pnand %p217_p0, %p211_p11 }
  0x20   :  { %221 = shalt.err (!%p218_p1)
}
  0x21   :  { %s252_s0 = smov 128   ;;  %s253_s7 = smov 8  }
  0x22   :  { %32 = dma.hbm_to_vmem [thread:$0]  %s325_s1, 512, %s278_s15, [#allocation6], %s252_s0, %s252_s0, %s253_s7  }
  0x23   :  { %244 = dma.done.wait [#allocation3], 128  }
  0x24   :  { %245 = vsyncadd [#allocation3], 4294967168 }
  0x25   :  { %246 = dma.done.wait [#allocation6], 512  }
  0x26   :  { %247 = vsyncadd [#allocation6], 4294966784  ;;  %v254_v0 = vmov 0.0|0.0   ;;  %vm255_vm0 = vmmov 0   ;;  %v256_v1 = vmov 0.0   ;;  %v42_v2 = vld [vmem:[#allocation5] sm:$0xff] }
  0x27   :  { %164 = vmatprep.subr.bf16.mxu0 %v254_v0  ;;  %161 = vmatprep.mubr.msk.f32.mxu0 %vm255_vm0, %v256_v1  ;;  %v43_v3 = vld [vmem:[#allocation5 + $0x8] sm:$0xff]  ;;  %v44_v4 = vld [vmem:[#allocation5 + $0x10] sm:$0xff]  ;;  %v45_v6 = vld [vmem:[#allocation5 + $0x18] sm:$0xff]  ;;  %vm46_vm1 = vcmask 261120   ;;  %s257_s11 = smov [#allocation7]   ;;  %vm128_vm2 = vcmask 80896  }
  0x28   :  { %v165_v5 = vpack.c.bf16 %v43_v3, %v42_v2  ;;  %v168_v7 = vpack.c.bf16 %v45_v6, %v44_v4  ;;  %v41_v8 = vld [vmem:[#allocation2] sm:$0xff]  ;;  %s136_s12 = sshll.u32 %s257_s11, 4  ;;  %s137_s12 = int_to_ptr.vmem [resolvable:$true] %s136_s12 }
  0x29   :  { %v147_v9 = vld [vmem:[%s326_s2] ss:$0 sm:$0xff]  ;;  %s222_s13 = scalar_lea.vmem %s137_s12, 128  ;;  %p227_p3 = scmp.lt.s32.totalorder %s137_s12, %s137_s12 }
  0x2a   :  { %166 = vmatpush3.bf16.msra.mxu0 %v165_v5  ;;  %p223_p2 = scmp.ne.s32.totalorder %s137_s12, %s222_s13  ;;  %p228_p4 = scmp.lt.s32.totalorder %s222_s13, %s222_s13 }
  0x2b   :  { %167 = vmatprep.subr.bf16.mxu0 %v254_v0 }
  0x2c   :  { %p229_p5 = por %p228_p4, %p227_p3 }
  0x2e   :  { %169 = vmatpush3.bf16.msra.mxu0 %v168_v7  ;;  %p230_p6 = pnand %p229_p5, %p223_p2 }
  0x31   :  { %162 = vmatmul.mubr.msk.f32.vlgmr.msra.gmra.mrb[0].mxu0 %vm46_vm1, %v41_v8 }
 0x104   :  { %v116_v10 = vpop.f32.mrb[0].mxu0 }
 0x105   :  { %v127_v11 = vadd.f32 %v147_v9, %v116_v10  ;;  %v163_v12 = vpop.f32.mrb[1].mxu0 }
 0x107   :  { %129 = vst.msk [vmem:[#allocation7] sm:$0xff] %vm128_vm2, %v127_v11 }
 0x108   :  { %233 = shalt.err (!%p230_p6)
}
 0x109   :  { %s234_s16 = scalar_lea.hbm %s327_s3, 128 }
 0x10a   :  { %p235_p7 = scmp.ne.s32.totalorder %s327_s3, %s234_s16  ;;  %p238_p8 = scmp.lt.u32.totalorder %s234_s16, %s327_s3 }
 0x10c   :  { %p240_p9 = pnand %p238_p8, %p235_p7 }
 0x10e   :  { %243 = shalt.err (!%p240_p9)
}
 0x10f   :  { %139 = dma.vmem_to_hbm [thread:$0]  %s137_s12, 128, %s327_s3, [#allocation4]  }
 0x110   :  { %248 = dma.done.wait [#allocation4], 128  }
 0x111   :  { %249 = vsyncadd [#allocation4], 4294967168 }
 0x112   :  { %143 = vsyncpa [#allocation3], 1 }
 0x113   :  { %144 = vsyncpa [#allocation6], 1 }
 0x114   :  { %145 = vsyncpa [#allocation4], 1 }

</bundles_post_ra>
